<compile_context>
chip_gen: v7x
topology: tpu7x:2x2x1
jax: 0.10.0
libtpu: 0.0.40
codegen_flags: <defaults>
</compile_context>

<pallas_src>
import functools

import jax
import jax.numpy as jnp
from jax.experimental import pallas as pl
from jax.experimental.pallas import tpu as pltpu

HIDDEN = 256
LANE = 128
SUBLANE_BF16 = 16          # bf16 sublane pack: slab segments start on 16-row
MAX_SINGLE_TILE_B = 512    # up to this batch, use one grid step (no tiling)
BATCH_TILE = 256           # batch tile when B > MAX_SINGLE_TILE_B


def _round_up(x, m):
    return ((x + m - 1) // m) * m


def actor_kernel(x_ref, w_ref, b_ref, o_ref):
    """Fused 3-layer MLP: tanh(relu(relu(x W1 + b1) W2 + b2) W3 + b3).

    x_ref : [Bt, S]            f32   (raw, un-padded state tile)
    w_ref : [s_seg + 2H, H]    bf16  (w1 rows [0:S] | w2 | w3[:, :A_pad] packed)
    b_ref : [3, H]             f32   (rows: b1, b2, b3-zero-padded)
    o_ref : [Bt, A_pad]        f32   (lane-dense; sliced to action_dim by the
                                      final consumer)
    """
    S = x_ref.shape[1]
    H = w_ref.shape[1]
    A_pad = o_ref.shape[1]
    w2_row0 = w_ref.shape[0] - 2 * H          # == s_seg (16-row aligned)

    x = x_ref[...].astype(jnp.bfloat16)       # [Bt, S]

    # Static, tile-aligned slices of the packed parameter slab.
    w1 = w_ref[0:S, :]                                  # [S, H]      bf16
    w2 = w_ref[w2_row0:w2_row0 + H, :]                  # [H, H]      bf16
    w3 = w_ref[w2_row0 + H:w2_row0 + 2 * H, 0:A_pad]    # [H, A_pad]  bf16

    b1 = b_ref[0:1, :]                                  # [1, H]      f32
    b2 = b_ref[1:2, :]                                  # [1, H]      f32
    b3 = b_ref[2:3, 0:A_pad]                            # [1, A_pad]  f32

    # MXU matmuls with bf16 operands, f32 accumulation; elementwise in f32.
    h1 = jnp.dot(x, w1, preferred_element_type=jnp.float32) + b1
    h1 = jnp.maximum(h1, 0.0)
    h2 = jnp.dot(h1.astype(jnp.bfloat16), w2,
                 preferred_element_type=jnp.float32) + b2
    h2 = jnp.maximum(h2, 0.0)
    h3 = jnp.dot(h2.astype(jnp.bfloat16), w3,
                 preferred_element_type=jnp.float32) + b3
    o_ref[...] = jnp.tanh(h3).astype(o_ref.dtype)


@functools.partial(jax.jit, static_argnames=("a_pad",))
def _actor_forward_padded(state, w_slab, b_pack, *, a_pad):
    """state: [B, state_dim] f32 -> lane-dense [B, a_pad] f32."""
    B, S = state.shape
    H = b_pack.shape[1]

    # Batch tiling: one grid step for small/medium batches (weights are DMA'd
    # exactly once either way thanks to the constant index_map); tile large
    # batches so v7x can split them across its two TensorCores.
    if B <= MAX_SINGLE_TILE_B:
        b_tile, n_tiles, b_padded = B, 1, B
    else:
        b_tile = BATCH_TILE
        n_tiles = (B + b_tile - 1) // b_tile
        b_padded = n_tiles * b_tile
        if b_padded != B:
            state = jnp.pad(state, ((0, b_padded - B), (0, 0)))

    flops = 2 * b_padded * (S * H + H * H + H * a_pad)
    bytes_accessed = (b_padded * S * 4            # state in
                      + w_slab.size * 2           # bf16 slab
                      + b_pack.size * 4           # f32 biases
                      + b_padded * a_pad * 4)     # output

    out = pl.pallas_call(
        actor_kernel,
        out_shape=jax.ShapeDtypeStruct((b_padded, a_pad), jnp.float32),
        grid=(n_tiles,),
        in_specs=[
            pl.BlockSpec((b_tile, S), lambda i: (i, 0)),
            pl.BlockSpec(w_slab.shape, lambda i: (0, 0)),   # constant -> resident
            pl.BlockSpec(b_pack.shape, lambda i: (0, 0)),   # constant -> resident
        ],
        out_specs=pl.BlockSpec((b_tile, a_pad), lambda i: (i, 0)),
        compiler_params=pltpu.CompilerParams(
            dimension_semantics=("parallel",)),
        cost_estimate=pl.CostEstimate(
            flops=flops,
            transcendentals=b_padded * a_pad,
            bytes_accessed=bytes_accessed),
    )(state, w_slab, b_pack)

    return out[:B] if b_padded != B else out


def actor_forward(state, packed):
    """Returns the lane-dense [B, a_pad] output.

    Real actions are columns [:action_dim]; slice at the final consumer to
    keep the latency-bound path free of extra HLO dispatches.
    """
    return _actor_forward_padded(state, packed["w_slab"], packed["b_pack"],
                                 a_pad=packed["a_pad"])


def init_actor_params(key, state_dim, action_dim):
    """PyTorch-nn.Linear-style init (U[-1/sqrt(fan_in), +]).

    Returns (packed_params_for_kernel, raw_f32_params_for_reference).
    """
    def linear(k, fan_in, fan_out):
        kw, kb = jax.random.split(k)
        bound = 1.0 / jnp.sqrt(float(fan_in))
        w = jax.random.uniform(kw, (fan_in, fan_out), jnp.float32, -bound, bound)
        b = jax.random.uniform(kb, (fan_out,), jnp.float32, -bound, bound)
        return w, b

    k1, k2, k3 = jax.random.split(key, 3)
    w1, b1 = linear(k1, state_dim, HIDDEN)
    w2, b2 = linear(k2, HIDDEN, HIDDEN)
    w3, b3 = linear(k3, HIDDEN, action_dim)

    # Segment starts inside the bf16 slab are aligned to the bf16 sublane pack
    # (16 rows) so the in-kernel static slices stay tile-aligned.
    s_seg = max(SUBLANE_BF16, _round_up(state_dim, SUBLANE_BF16))
    a_pad = max(LANE, _round_up(action_dim, LANE))
    assert a_pad <= HIDDEN, "weight packing assumes action_dim <= 256"

    # One bf16 slab holding all three (zero-padded) weight matrices:
    #   rows [0, state_dim)            -> w1  (rows up to s_seg stay zero)
    #   rows [s_seg, s_seg+H)          -> w2
    #   rows [s_seg+H, s_seg+2H)       -> w3 (first a_pad cols used, rest zero)
    w_slab = jnp.zeros((s_seg + 2 * HIDDEN, HIDDEN), jnp.float32)
    w_slab = w_slab.at[:state_dim, :].set(w1)
    w_slab = w_slab.at[s_seg:s_seg + HIDDEN, :].set(w2)
    w_slab = w_slab.at[s_seg + HIDDEN:s_seg + 2 * HIDDEN, :action_dim].set(w3)
    w_slab = w_slab.astype(jnp.bfloat16)

    # One f32 array holding all three biases (b3 zero-padded).
    b_pack = jnp.zeros((3, HIDDEN), jnp.float32)
    b_pack = b_pack.at[0, :].set(b1)
    b_pack = b_pack.at[1, :].set(b2)
    b_pack = b_pack.at[2, :action_dim].set(b3)

    packed = dict(w_slab=w_slab, b_pack=b_pack,
                  state_dim=state_dim, action_dim=action_dim, a_pad=a_pad)
    raw = dict(w1=w1, b1=b1, w2=w2, b2=b2, w3=w3, b3=b3)
    return packed, raw


def actor_forward_ref(state, p):
    """Pure-JAX f32 reference matching the PyTorch module."""
    h1 = jax.nn.relu(state @ p["w1"] + p["b1"])
    h2 = jax.nn.relu(h1 @ p["w2"] + p["b2"])
    return jnp.tanh(h2 @ p["w3"] + p["b3"])


if __name__ == "__main__":
    key = jax.random.PRNGKey(0)
    k_state, k_params = jax.random.split(key)

    batch, state_dim, action_dim = 8, 32, 8
    state = jax.random.normal(k_state, (batch, state_dim), jnp.float32)
    packed, raw = init_actor_params(k_params, state_dim, action_dim)

    out_padded = jax.block_until_ready(actor_forward(state, packed))
    assert out_padded.shape == (batch, packed["a_pad"])

    # Final consumer slices the real action columns off the lane-dense slab.
    out = out_padded[:, :action_dim]
    ref = actor_forward_ref(state, raw)
    assert out.shape == (batch, action_dim)
    # bf16 MXU operands (f32 accumulation) -> relax tolerance vs pure-f32 ref.
    assert jnp.allclose(out, ref, atol=2e-2, rtol=2e-2), (
        f"max abs diff = {jnp.max(jnp.abs(out - ref))}")

    print("KERNEL_OK")
</pallas_src>

<mosaic_0001>
module attributes {stable_mosaic.version = 11 : i64} {
  func.func @actor_kernel(%arg0: i32, %arg1: memref<8x32xf32, #tpu.memory_space<vmem>>, %arg2: memref<544x256xbf16, #tpu.memory_space<vmem>>, %arg3: memref<3x256xf32, #tpu.memory_space<vmem>>, %arg4: memref<8x128xf32, #tpu.memory_space<vmem>>) attributes {dimension_semantics = [#tpu.dimension_semantics<parallel>], iteration_bounds = array<i64: 1>, scalar_prefetch = 0 : i64, scratch_operands = 0 : i64, tpu.core_type = #tpu.core_type<tc>, window_params = [{transform_indices = @transform_0, window_bounds = array<i64: 8, 32>}, {pipeline_mode = #tpu.pipeline_mode<synchronous>, transform_indices = @transform_1, window_bounds = array<i64: 544, 256>}, {pipeline_mode = #tpu.pipeline_mode<synchronous>, transform_indices = @transform_2, window_bounds = array<i64: 3, 256>}, {transform_indices = @transform_3, window_bounds = array<i64: 8, 128>}]} {
    %c0 = arith.constant 0 : index
    %c0_0 = arith.constant 0 : index
    %0 = vector.load %arg1[%c0, %c0_0] : memref<8x32xf32, #tpu.memory_space<vmem>>, vector<8x32xf32>
    %1 = arith.truncf %0 : vector<8x32xf32> to vector<8x32xbf16>
    %c0_1 = arith.constant 0 : index
    %c0_2 = arith.constant 0 : index
    %2 = vector.load %arg2[%c0_1, %c0_2] : memref<544x256xbf16, #tpu.memory_space<vmem>>, vector<32x256xbf16>
    %c32 = arith.constant 32 : index
    %c0_3 = arith.constant 0 : index
    %3 = vector.load %arg2[%c32, %c0_3] : memref<544x256xbf16, #tpu.memory_space<vmem>>, vector<256x256xbf16>
    %c288 = arith.constant 288 : index
    %c0_4 = arith.constant 0 : index
    %4 = vector.load %arg2[%c288, %c0_4] : memref<544x256xbf16, #tpu.memory_space<vmem>>, vector<256x128xbf16>
    %c0_5 = arith.constant 0 : index
    %c0_6 = arith.constant 0 : index
    %5 = vector.load %arg3[%c0_5, %c0_6] : memref<3x256xf32, #tpu.memory_space<vmem>>, vector<1x256xf32>
    %c1 = arith.constant 1 : index
    %c0_7 = arith.constant 0 : index
    %6 = vector.load %arg3[%c1, %c0_7] : memref<3x256xf32, #tpu.memory_space<vmem>>, vector<1x256xf32>
    %c2 = arith.constant 2 : index
    %c0_8 = arith.constant 0 : index
    %7 = vector.load %arg3[%c2, %c0_8] : memref<3x256xf32, #tpu.memory_space<vmem>>, vector<1x128xf32>
    %cst = arith.constant dense<0.000000e+00> : vector<8x256xf32>
    %8 = tpu.matmul %1, %2, %cst {dimension_numbers = #tpu.dot_dimension_numbers<[1], [0], [0], [1], [0, 0, 1, 1], [], []>} : vector<8x32xbf16>, vector<32x256xbf16>, vector<8x256xf32> -> vector<8x256xf32>
    %9 = vector.broadcast %5 : vector<1x256xf32> to vector<8x256xf32>
    %10 = arith.addf %8, %9 : vector<8x256xf32>
    %cst_9 = arith.constant 0.000000e+00 : f32
    %11 = vector.broadcast %cst_9 : f32 to vector<8x256xf32>
    %12 = arith.maximumf %10, %11 : vector<8x256xf32>
    %13 = arith.truncf %12 : vector<8x256xf32> to vector<8x256xbf16>
    %cst_10 = arith.constant dense<0.000000e+00> : vector<8x256xf32>
    %14 = tpu.matmul %13, %3, %cst_10 {dimension_numbers = #tpu.dot_dimension_numbers<[1], [0], [0], [1], [0, 0, 1, 1], [], []>} : vector<8x256xbf16>, vector<256x256xbf16>, vector<8x256xf32> -> vector<8x256xf32>
    %15 = vector.broadcast %6 : vector<1x256xf32> to vector<8x256xf32>
    %16 = arith.addf %14, %15 : vector<8x256xf32>
    %cst_11 = arith.constant 0.000000e+00 : f32
    %17 = vector.broadcast %cst_11 : f32 to vector<8x256xf32>
    %18 = arith.maximumf %16, %17 : vector<8x256xf32>
    %19 = arith.truncf %18 : vector<8x256xf32> to vector<8x256xbf16>
    %cst_12 = arith.constant dense<0.000000e+00> : vector<8x128xf32>
    %20 = tpu.matmul %19, %4, %cst_12 {dimension_numbers = #tpu.dot_dimension_numbers<[1], [0], [0], [1], [0, 0, 1, 1], [], []>} : vector<8x256xbf16>, vector<256x128xbf16>, vector<8x128xf32> -> vector<8x128xf32>
    %21 = vector.broadcast %7 : vector<1x128xf32> to vector<8x128xf32>
    %22 = arith.addf %20, %21 : vector<8x128xf32>
    %23 = math.tanh %22 : vector<8x128xf32>
    %c0_13 = arith.constant 0 : index
    %c0_14 = arith.constant 0 : index
    %24 = vector.load %arg4[%c0_13, %c0_14] : memref<8x128xf32, #tpu.memory_space<vmem>>, vector<8x128xf32>
    tpu.vector_store %arg4[%c0_13, %c0_14], %23 {strides = array<i32>} : memref<8x128xf32, #tpu.memory_space<vmem>>, vector<8x128xf32>,
    return
  }
  func.func @transform_0(%arg0: i32) -> (i32, i32) {
    %c0_i32 = arith.constant 0 : i32
    %c0_i32_0 = arith.constant 0 : i32
    return %arg0, %c0_i32 : i32, i32
  }
  func.func @transform_1(%arg0: i32) -> (i32, i32) {
    %c0_i32 = arith.constant 0 : i32
    %c0_i32_0 = arith.constant 0 : i32
    %c0_i32_1 = arith.constant 0 : i32
    return %c0_i32, %c0_i32_0 : i32, i32
  }
  func.func @transform_2(%arg0: i32) -> (i32, i32) {
    %c0_i32 = arith.constant 0 : i32
    %c0_i32_0 = arith.constant 0 : i32
    %c0_i32_1 = arith.constant 0 : i32
    return %c0_i32, %c0_i32_0 : i32, i32
  }
  func.func @transform_3(%arg0: i32) -> (i32, i32) {
    %c0_i32 = arith.constant 0 : i32
    %c0_i32_0 = arith.constant 0 : i32
    return %arg0, %c0_i32 : i32, i32
  }
}

</mosaic_0001>

<bundles_post_ra>
// kernel: _actor_forward_padded.1
= control target key start
LH: loop header
LB: loop body
LE: loop exit
PB: predicated region body
PF: predicated region fallthrough
CT: control target
= control target key end

     0   :  { %8 = vsyncpa [#allocation3], 0  ;;  %s905_s0 = inlined_call_operand.hbm [shape: f32[8,32], index: 0, kind: input, shape index: {}]   ;;  %s906_s1 = inlined_call_operand.hbm [shape: bf16[544,256], index: 1, kind: input, shape index: {}]   ;;  %s907_s2 = inlined_call_operand.hbm [shape: f32[3,256], index: 2, kind: input, shape index: {}]   ;;  %s908_s3 = inlined_call_operand.hbm [shape: f32[8,128], index: 3, kind: output, shape index: {}]  }
   0x1   :  { %9 = vsyncpa [#allocation6], 0 }
   0x2   :  { %10 = vsyncpa [#allocation4], 0  ;;  %s830_s12 = smov [#allocation5]   ;;  %s736_s16 = scalar_lea.hbm %s906_s1, 8704 }
   0x3   :  { %s26_s13 = sshll.u32 %s830_s12, 4  ;;  %p737_p0 = scmp.ne.s32.totalorder %s906_s1, %s736_s16  ;;  %s27_s13 = int_to_ptr.vmem [resolvable:$true] %s26_s13 }
   0x4   :  { %p740_p1 = scmp.lt.u32.totalorder %s736_s16, %s906_s1 }
   0x6   :  { %p742_p2 = pnand %p740_p1, %p737_p0 }
   0x8   :  { %745 = shalt.err (!%p742_p2)
}
   0x9   :  { %s746_s21 = scalar_lea.vmem %s27_s13, 8704  ;;  %p751_p4 = scmp.lt.s32.totalorder %s27_s13, %s27_s13 }
   0xa   :  { %p747_p3 = scmp.ne.s32.totalorder %s27_s13, %s746_s21  ;;  %p752_p5 = scmp.lt.s32.totalorder %s746_s21, %s746_s21 }
   0xc   :  { %p753_p6 = por %p752_p5, %p751_p4 }
   0xe   :  { %p754_p7 = pnand %p753_p6, %p747_p3 }
  0x10   :  { %757 = shalt.err (!%p754_p7)
}
  0x11   :  { %s831_s22 = smov 128   ;;  %s832_s23 = smov 8  }
  0x12   :  { %32 = dma.hbm_to_vmem [thread:$0]  %s906_s1, 8704, %s27_s13, [#allocation6], %s831_s22, %s831_s22, %s832_s23  }
  0x13   :  { %s833_s26 = smov [#allocation2]   ;;  %s834_s28 = smov [#allocation7]  }
  0x14   :  { %s17_s27 = sshll.u32 %s833_s26, 4  ;;  %s39_s29 = sshll.u32 %s834_s28, 4  ;;  %s18_s27 = int_to_ptr.vmem [resolvable:$true] %s17_s27  ;;  %s40_s29 = int_to_ptr.vmem [resolvable:$true] %s39_s29 }
  0x15   :  { %s758_s5 = scalar_lea.hbm %s905_s0, 128 }
  0x16   :  { %p759_p8 = scmp.ne.s32.totalorder %s905_s0, %s758_s5  ;;  %p762_p9 = scmp.lt.u32.totalorder %s758_s5, %s905_s0 }
  0x18   :  { %p764_p10 = pnand %p762_p9, %p759_p8 }
  0x1a   :  { %767 = shalt.err (!%p764_p10)
}
  0x1b   :  { %s768_s1 = scalar_lea.vmem %s18_s27, 128  ;;  %p773_p12 = scmp.lt.s32.totalorder %s18_s27, %s18_s27 }
  0x1c   :  { %p769_p11 = scmp.ne.s32.totalorder %s18_s27, %s768_s1  ;;  %p774_p13 = scmp.lt.s32.totalorder %s768_s1, %s768_s1 }
  0x1e   :  { %p775_p0 = por %p774_p13, %p773_p12 }
  0x20   :  { %p776_p1 = pnand %p775_p0, %p769_p11 }
  0x22   :  { %779 = shalt.err (!%p776_p1)
}
  0x23   :  { %20 = dma.hbm_to_vmem [thread:$0]  %s905_s0, 128, %s18_s27, [#allocation3]  }
  0x24   :  { %s780_s14 = scalar_lea.hbm %s907_s2, 128 }
  0x25   :  { %p781_p2 = scmp.ne.s32.totalorder %s907_s2, %s780_s14  ;;  %p784_p3 = scmp.lt.u32.totalorder %s780_s14, %s907_s2 }
  0x27   :  { %p786_p4 = pnand %p784_p3, %p781_p2 }
  0x29   :  { %789 = shalt.err (!%p786_p4)
}
  0x2a   :  { %s790_s19 = scalar_lea.vmem %s40_s29, 128  ;;  %p795_p6 = scmp.lt.s32.totalorder %s40_s29, %s40_s29 }
  0x2b   :  { %p791_p5 = scmp.ne.s32.totalorder %s40_s29, %s790_s19  ;;  %p796_p7 = scmp.lt.s32.totalorder %s790_s19, %s790_s19 }
  0x2d   :  { %p797_p8 = por %p796_p7, %p795_p6 }
  0x2f   :  { %p798_p9 = pnand %p797_p8, %p791_p5 }
  0x31   :  { %801 = shalt.err (!%p798_p9)
}
  0x32   :  { %42 = dma.hbm_to_vmem [thread:$0]  %s907_s2, 128, %s40_s29, [#allocation6]  }
  0x33   :  { %824 = dma.done.wait [#allocation3], 128  }
  0x34   :  { %825 = vsyncadd [#allocation3], 4294967168 }
  0x35   :  { %826 = dma.done.wait [#allocation6], 8832  }
  0x36   :  { %827 = vsyncadd [#allocation6], 4294958464  ;;  %v835_v0 = vmov 0   ;;  %v664_v1 = vld [vmem:[#allocation5 + $0x4] ss:$8 sps:$4 sm:$0xff]   ;;  %v53_v5 = vld [vmem:[#allocation2] sm:$0xff]  ;;  %v128_v51 = vlaneseq }
  0x37   :  { %194 = vmatprep.mubr.bf16.mxu0 %v835_v0  ;;  %v666_v2 = vld [vmem:[#allocation5] ss:$8 sps:$4 sm:$0xff]   ;;  %162 = vmatprep.subr.bf16.mxu0 %v664_v1  ;;  %v667_v3 = vld [vmem:[#allocation5 + $0x14] ss:$8 sps:$4 sm:$0xff]   ;;  %v669_v4 = vld [vmem:[#allocation5 + $0x10] ss:$8 sps:$4 sm:$0xff]   ;;  %v54_v9 = vpack.c.bf16 %v53_v5, %v53_v5 }
  0x38   :  { %163 = vmatpush1.bf16.msra.mxu0 %v666_v2  ;;  %v670_v6 = vld [vmem:[#allocation5 + $0x24] ss:$8 sps:$4 sm:$0xff]   ;;  %v672_v7 = vld [vmem:[#allocation5 + $0x20] ss:$8 sps:$4 sm:$0xff]   ;;  %v673_v8 = vld [vmem:[#allocation5 + $0x34] ss:$8 sps:$4 sm:$0xff]  }
  0x39   :  { %164 = vmatprep.subr.bf16.mxu0 %v667_v3  ;;  %378 = vmatprep.subr.bf16.mxu1 %v670_v6  ;;  %v675_v10 = vld [vmem:[#allocation5 + $0x30] ss:$8 sps:$4 sm:$0xff]   ;;  %vm158_vm0 = vcmask 261120   ;;  %v676_v11 = vld [vmem:[#allocation5 + $0x44] ss:$8 sps:$4 sm:$0xff]   ;;  %v129_v52 = vshrl.u32 %v128_v51, 7 }
  0x3a   :  { %379 = vmatpush1.bf16.msra.mxu1 %v672_v7  ;;  %v678_v12 = vld [vmem:[#allocation5 + $0x40] ss:$8 sps:$4 sm:$0xff]   ;;  %v679_v13 = vld [vmem:[#allocation5 + $0x54] ss:$8 sps:$4 sm:$0xff]   ;;  %v681_v14 = vld [vmem:[#allocation5 + $0x50] ss:$8 sps:$4 sm:$0xff]  }
  0x3b   :  { %380 = vmatprep.subr.bf16.mxu1 %v673_v8  ;;  %v682_v15 = vld [vmem:[#allocation5 + $0x64] ss:$8 sps:$4 sm:$0xff]   ;;  %v684_v16 = vld [vmem:[#allocation5 + $0x60] ss:$8 sps:$4 sm:$0xff]   ;;  %v685_v17 = vld [vmem:[#allocation5 + $0x74] ss:$8 sps:$4 sm:$0xff]  }
  0x3c   :  { %165 = vmatpush1.bf16.msra.mxu0 %v669_v4  ;;  %v687_v18 = vld [vmem:[#allocation5 + $0x70] ss:$8 sps:$4 sm:$0xff]   ;;  %v688_v19 = vld [vmem:[#allocation5 + $0x84] ss:$8 sps:$4 sm:$0xff]   ;;  %v690_v20 = vld [vmem:[#allocation5 + $0x80] ss:$8 sps:$4 sm:$0xff]  }
  0x3d   :  { %v691_v21 = vld [vmem:[#allocation5 + $0x94] ss:$8 sps:$4 sm:$0xff]   ;;  %v693_v22 = vld [vmem:[#allocation5 + $0x90] ss:$8 sps:$4 sm:$0xff]   ;;  %v694_v23 = vld [vmem:[#allocation5 + $0xa4] ss:$8 sps:$4 sm:$0xff]  }
  0x3e   :  { %381 = vmatpush1.bf16.msra.mxu1 %v675_v10  ;;  %v696_v24 = vld [vmem:[#allocation5 + $0xa0] ss:$8 sps:$4 sm:$0xff]   ;;  %v697_v25 = vld [vmem:[#allocation5 + $0xb4] ss:$8 sps:$4 sm:$0xff]   ;;  %v699_v26 = vld [vmem:[#allocation5 + $0xb0] ss:$8 sps:$4 sm:$0xff]  }
  0x3f   :  { %585 = vmatmul.mubr.msk.bf16.vlgmr.msra.gmra.mrb[0].mxu0 %vm158_vm0, %v54_v9  ;;  %382 = vmatprep.subr.bf16.mxu1 %v676_v11  ;;  %v700_v27 = vld [vmem:[#allocation5 + $0xc4] ss:$8 sps:$4 sm:$0xff]   ;;  %v702_v28 = vld [vmem:[#allocation5 + $0xc0] ss:$8 sps:$4 sm:$0xff]   ;;  %v703_v29 = vld [vmem:[#allocation5 + $0xd4] ss:$8 sps:$4 sm:$0xff]  }
  0x40   :  { %v705_v30 = vld [vmem:[#allocation5 + $0xd0] ss:$8 sps:$4 sm:$0xff]   ;;  %v706_v31 = vld [vmem:[#allocation5 + $0xe4] ss:$8 sps:$4 sm:$0xff]   ;;  %v708_v32 = vld [vmem:[#allocation5 + $0xe0] ss:$8 sps:$4 sm:$0xff]  }
  0x41   :  { %v709_v33 = vld [vmem:[#allocation5 + $0xf4] ss:$8 sps:$4 sm:$0xff]   ;;  %v711_v34 = vld [vmem:[#allocation5 + $0xf0] ss:$8 sps:$4 sm:$0xff]   ;;  %v712_v35 = vld [vmem:[#allocation5 + $0x104] ss:$8 sps:$4 sm:$0xff]  }
  0x42   :  { %383 = vmatpush1.bf16.msra.mxu1 %v678_v12  ;;  %v714_v36 = vld [vmem:[#allocation5 + $0x100] ss:$8 sps:$4 sm:$0xff]   ;;  %v715_v37 = vld [vmem:[#allocation5 + $0x114] ss:$8 sps:$4 sm:$0xff]   ;;  %v717_v38 = vld [vmem:[#allocation5 + $0x110] ss:$8 sps:$4 sm:$0xff]  }
  0x43   :  { %384 = vmatprep.subr.bf16.mxu1 %v679_v13  ;;  %v718_v39 = vld [vmem:[#allocation5 + $0x1a0] ss:$8 sps:$4 sm:$0xff]   ;;  %v720_v41 = vld [vmem:[#allocation5 + $0x1b0] ss:$8 sps:$4 sm:$0xff]   ;;  %v130_v53 = vsub.s32 0, %v129_v52  ;;  %v134_v55 = vsub.s32 1, %v129_v52 }
  0x44   :  { %v719_v40 = vld [vmem:[#allocation5 + $0x120] ss:$8 sps:$4 sm:$0xff]   ;;  %635 = vmatprep.subr.bf16.mxu0 %v718_v39  ;;  %v721_v42 = vld [vmem:[#allocation5 + $0x130] ss:$8 sps:$4 sm:$0xff]   ;;  %s836_s2 = smov [#allocation8]  }
  0x45   :  { %636 = vmatpush3.bf16.msra.mxu0 %v719_v40  ;;  %v722_v43 = vld [vmem:[#allocation5 + $0x1c0] ss:$8 sps:$4 sm:$0xff]   ;;  %v724_v45 = vld [vmem:[#allocation5 + $0x1d0] ss:$8 sps:$4 sm:$0xff]   ;;  %s571_s21 = sshll.u32 %s836_s2, 4  ;;  %s572_s21 = int_to_ptr.vmem [resolvable:$true] %s571_s21 }
  0x46   :  { %385 = vmatpush1.bf16.msra.mxu1 %v681_v14  ;;  %637 = vmatprep.subr.bf16.mxu0 %v720_v41  ;;  %v723_v44 = vld [vmem:[#allocation5 + $0x140] ss:$8 sps:$4 sm:$0xff]   ;;  %v725_v46 = vld [vmem:[#allocation5 + $0x150] ss:$8 sps:$4 sm:$0xff]   ;;  %s802_s22 = scalar_lea.vmem %s572_s21, 128  ;;  %p807_p11 = scmp.lt.s32.totalorder %s572_s21, %s572_s21 }
  0x47   :  { %386 = vmatprep.subr.bf16.mxu1 %v682_v15  ;;  %v726_v47 = vld [vmem:[#allocation5 + $0x1e0] ss:$8 sps:$4 sm:$0xff]   ;;  %v728_v49 = vld [vmem:[#allocation5 + $0x1f0] ss:$8 sps:$4 sm:$0xff]   ;;  %p803_p10 = scmp.ne.s32.totalorder %s572_s21, %s802_s22  ;;  %p808_p12 = scmp.lt.s32.totalorder %s802_s22, %s802_s22 }
  0x48   :  { %v727_v48 = vld [vmem:[#allocation5 + $0x160] ss:$8 sps:$4 sm:$0xff]   ;;  %v729_v50 = vld [vmem:[#allocation5 + $0x170] ss:$8 sps:$4 sm:$0xff]  }
  0x49   :  { %638 = vmatpush3.bf16.msra.mxu0 %v721_v42  ;;  %v123_v54 = vld [vmem:[#allocation7] ss:$4 sm:$0x3]  ;;  %v732_v6 = vld [vmem:[#allocation5 + $0x210] ss:$8 sps:$4 sm:$0xff]   ;;  %p809_p13 = por %p808_p12, %p807_p11 }
  0x4a   :  { %387 = vmatpush1.bf16.msra.mxu1 %v684_v16  ;;  %639 = vmatprep.subr.bf16.mxu0 %v722_v43  ;;  %v131_v56 = vrot.slane %v123_v54, %v130_v53  ;;  %v135_v57 = vrot.slane %v123_v54, %v134_v55  ;;  %v730_v4 = vld [vmem:[#allocation5 + $0x200] ss:$8 sps:$4 sm:$0xff]   ;;  %v733_v7 = vld [vmem:[#allocation5 + $0x190] ss:$8 sps:$4 sm:$0xff]  }
  0x4b   :  { %388 = vmatprep.subr.bf16.mxu1 %v685_v17  ;;  %v731_v5 = vld [vmem:[#allocation5 + $0x180] ss:$8 sps:$4 sm:$0xff]   ;;  %p810_p0 = pnand %p809_p13, %p803_p10 }
  0x4c   :  { %v125_v8 = vld [vmem:[#allocation7 + $0x1] ss:$4 sm:$0x3] }
  0x4d   :  { %640 = vmatpush3.bf16.msra.mxu0 %v723_v44  ;;  %v211_v9 = vrot.slane %v125_v8, %v130_v53  ;;  %v215_v10 = vrot.slane %v125_v8, %v134_v55 }
  0x4e   :  { %389 = vmatpush1.bf16.msra.mxu1 %v687_v18  ;;  %641 = vmatprep.subr.bf16.mxu0 %v724_v45 }
  0x4f   :  { %390 = vmatprep.subr.bf16.mxu1 %v688_v19 }
  0x51   :  { %642 = vmatpush3.bf16.msra.mxu0 %v725_v46 }
  0x52   :  { %391 = vmatpush1.bf16.msra.mxu1 %v690_v20  ;;  %643 = vmatprep.subr.bf16.mxu0 %v726_v47 }
  0x53   :  { %392 = vmatprep.subr.bf16.mxu1 %v691_v21 }
  0x55   :  { %644 = vmatpush3.bf16.msra.mxu0 %v727_v48 }
  0x56   :  { %393 = vmatpush1.bf16.msra.mxu1 %v693_v22  ;;  %645 = vmatprep.subr.bf16.mxu0 %v728_v49  ;;  %v618_v22 = vld [vmem:[#allocation7 + $0x2] ss:$0 sm:$0xff] }
  0x57   :  { %394 = vmatprep.subr.bf16.mxu1 %v694_v23 }
  0x59   :  { %646 = vmatpush3.bf16.msra.mxu0 %v729_v50 }
  0x5a   :  { %395 = vmatpush1.bf16.msra.mxu1 %v696_v24  ;;  %647 = vmatprep.subr.bf16.mxu0 %v730_v4 }
  0x5b   :  { %396 = vmatprep.subr.bf16.mxu1 %v697_v25 }
  0x5d   :  { %648 = vmatpush3.bf16.msra.mxu0 %v731_v5 }
  0x5e   :  { %397 = vmatpush1.bf16.msra.mxu1 %v699_v26  ;;  %649 = vmatprep.subr.bf16.mxu0 %v732_v6 }
  0x5f   :  { %398 = vmatprep.subr.bf16.mxu1 %v700_v27 }
  0x61   :  { %650 = vmatpush3.bf16.msra.mxu0 %v733_v7 }
  0x62   :  { %399 = vmatpush1.bf16.msra.mxu1 %v702_v28 }
  0x63   :  { %400 = vmatprep.subr.bf16.mxu1 %v703_v29 }
  0x66   :  { %401 = vmatpush1.bf16.msra.mxu1 %v705_v30 }
  0x67   :  { %402 = vmatprep.subr.bf16.mxu1 %v706_v31 }
  0x6a   :  { %403 = vmatpush1.bf16.msra.mxu1 %v708_v32 }
  0x6b   :  { %404 = vmatprep.subr.bf16.mxu1 %v709_v33 }
  0x6e   :  { %405 = vmatpush1.bf16.msra.mxu1 %v711_v34 }
  0x6f   :  { %406 = vmatprep.subr.bf16.mxu1 %v712_v35 }
  0x72   :  { %407 = vmatpush1.bf16.msra.mxu1 %v714_v36 }
  0x73   :  { %408 = vmatprep.subr.bf16.mxu1 %v715_v37 }
  0x76   :  { %409 = vmatpush1.bf16.msra.mxu1 %v717_v38 }
 0x112   :  { %v196_v58 = vpop.f32.mrb[0].mxu0 }
 0x113   :  { %v197_v59 = vadd.f32 %v196_v58, %v131_v56  ;;  %v198_v60 = vpop.f32.mrb[1].mxu0 }
 0x114   :  { %v199_v61 = vadd.f32 %v198_v60, %v135_v57  ;;  %v200_v62 = vpop.f32.mrb[2].mxu0 }
 0x115   :  { %v203_v63 = vmax.f32 %v197_v59, 0.0  ;;  %v201_v0 = vpop.f32.mrb[3].mxu0 }
 0x116   :  { %v204_v1 = vmax.f32 %v199_v61, 0.0 }
 0x117   :  { %v205_v3 = vpack.c.bf16 %v203_v63, %v203_v63 }
 0x118   :  { %v206_v2 = vpack.c.bf16 %v204_v1, %v204_v1 }
 0x11a   :  { %410 = vmatprep.mubr.bf16.mxu1 %v206_v2 }
 0x11b   :  { %411 = vmatmul.mubr.bf16.vlgmr.msra.gmra.mrb[0].mxu1 %v205_v3 }
 0x1ee   :  { %v412_v11 = vpop.f32.mrb[0].mxu1 }
 0x1ef   :  { %v413_v12 = vadd.f32 %v412_v11, %v211_v9  ;;  %v414_v13 = vpop.f32.mrb[1].mxu1 }
 0x1f0   :  { %v415_v14 = vadd.f32 %v414_v13, %v215_v10  ;;  %v416_v15 = vpop.f32.mrb[2].mxu1 }
 0x1f1   :  { %v419_v16 = vmax.f32 %v413_v12, 0.0  ;;  %v417_v17 = vpop.f32.mrb[3].mxu1 }
 0x1f2   :  { %v420_v18 = vmax.f32 %v415_v14, 0.0 }
 0x1f3   :  { %v421_v20 = vpack.c.bf16 %v419_v16, %v419_v16 }
 0x1f4   :  { %v422_v19 = vpack.c.bf16 %v420_v18, %v420_v18 }
 0x1f6   :  { %555 = vmatprep.mubr.bf16.mxu0 %v422_v19 }
 0x1f7   :  { %556 = vmatmul.mubr.bf16.vlgmr.msra.gmra.mrb[4].mxu0 %v421_v20 }
 0x2ca   :  { %v651_v21 = vpop.f32.mrb[4].mxu0 }
 0x2cb   :  { %v652_v23 = vpop.f32.mrb[5].mxu0 }
 0x2cc   :  { %v653_v24 = vadd.f32 %v652_v23, %v651_v21  ;;  %v654_v25 = vpop.f32.mrb[6].mxu0 }
 0x2cd   :  { %v655_v26 = vpop.f32.mrb[7].mxu0 }
 0x2ce   :  { %v558_v27 = vadd.f32 %v653_v24, %v618_v22 }
 0x2d0   :  { %734 = vtanh.f32 %v558_v27 }
 0x2da   :  { %v735_v28 = vpop.eup %734 }
 0x2db   :  { %564 = vst [vmem:[#allocation8] sm:$0xff] %v735_v28 }
 0x2dc   :  { %813 = shalt.err (!%p810_p0)
}
 0x2dd   :  { %s814_s25 = scalar_lea.hbm %s908_s3, 128 }
 0x2de   :  { %p815_p1 = scmp.ne.s32.totalorder %s908_s3, %s814_s25  ;;  %p818_p2 = scmp.lt.u32.totalorder %s814_s25, %s908_s3 }
 0x2e0   :  { %p820_p3 = pnand %p818_p2, %p815_p1 }
 0x2e2   :  { %823 = shalt.err (!%p820_p3)
}
 0x2e3   :  { %574 = dma.vmem_to_hbm [thread:$0]  %s572_s21, 128, %s908_s3, [#allocation4]  }
 0x2e4   :  { %828 = dma.done.wait [#allocation4], 128  }
 0x2e5   :  { %829 = vsyncadd [#allocation4], 4294967168 }
 0x2e6   :  { %578 = vsyncpa [#allocation3], 1 }
 0x2e7   :  { %579 = vsyncpa [#allocation6], 1 }
 0x2e8   :  { %580 = vsyncpa [#allocation4], 1 }

</bundles_post_ra>
